<compile_context>
chip_gen: v5e
topology: v5e:2x2
jax: 0.10.0
libtpu: 0.0.40
codegen_flags: <defaults>
</compile_context>

<pallas_src>
import functools
import math

import jax
import jax.numpy as jnp
from jax import lax
from jax.experimental import pallas as pl
from jax.experimental.pallas import tpu as pltpu


def _attn_kernel(x_ref, w_ref, b_ref, o_ref, *, e_qk_pad, e_v_pad):
    # x_ref: (B, L, D)   w_ref: (D, 2*Eqp + Evp)   b_ref: (1, 2*Eqp + Evp)   o_ref: (B, L, Evp)
    B, L, D = x_ref.shape

    # Fused Q/K/V pointwise conv (kernel_size=1) as a single tall matmul.
    # Scale (1/sqrt(E_qk)) is already folded into the Q columns of w/b.
    x = x_ref[...].reshape(B * L, D)
    qkv = jnp.dot(x, w_ref[...], preferred_element_type=jnp.float32) + b_ref[...]

    q = qkv[:, :e_qk_pad].reshape(B, L, e_qk_pad)
    k = qkv[:, e_qk_pad:2 * e_qk_pad].reshape(B, L, e_qk_pad)
    v = qkv[:, 2 * e_qk_pad:].reshape(B, L, e_v_pad)

    # scores = (q * scale) @ k^T per example; contract last dims directly (no transpose).
    s = lax.dot_general(q, k, (((2,), (2,)), ((0,), (0,))),
                        preferred_element_type=jnp.float32)          # (B, L, L)
    s = s - jnp.max(s, axis=-1, keepdims=True)
    p = jnp.exp(s)
    p = p * pl.reciprocal(jnp.sum(p, axis=-1, keepdims=True), approx=True)

    o = lax.dot_general(p, v, (((2,), (1,)), ((0,), (0,))),
                        preferred_element_type=jnp.float32)          # (B, L, Evp)
    o_ref[...] = o.astype(o_ref.dtype)


def _round_up(x, m):
    return (x + m - 1) // m * m


def self_attention_layer(x, wq, bq, wk, bk, wv, bv, *, batch_block=None):
    """x: (N, L, D). wq/wk: (E_qk, D), wv: (E_v, D). bq/bk: (1, E_qk), bv: (1, E_v).

    Equivalent to SelfAttentionLayer.forward with kernel_size=1, linear=False, attn_mask=None.
    Returns (N, L, E_v)."""
    N, L, D = x.shape
    E_qk = wq.shape[0]
    E_v = wv.shape[0]
    dtype = x.dtype

    # PyTorch SDPA default scale uses the *unpadded* query width; fold it into Wq / bq.
    scale = 1.0 / math.sqrt(E_qk)

    LANE = 128
    e_qk_pad = _round_up(E_qk, LANE)
    e_v_pad = _round_up(E_v, LANE)

    def pad_cols(w_t, b, e_pad):
        # w_t: (D, E), b: (1, E) -> zero-padded to e_pad lanes (zero columns are inert).
        e = w_t.shape[1]
        w_p = jnp.zeros((D, e_pad), dtype).at[:, :e].set(w_t.astype(dtype))
        b_p = jnp.zeros((1, e_pad), dtype).at[:, :e].set(b.astype(dtype))
        return w_p, b_p

    wq_p, bq_p = pad_cols(wq.T * scale, bq * scale, e_qk_pad)
    wk_p, bk_p = pad_cols(wk.T, bk, e_qk_pad)
    wv_p, bv_p = pad_cols(wv.T, bv, e_v_pad)

    w_qkv = jnp.concatenate([wq_p, wk_p, wv_p], axis=1)   # (D, 2*Eqp + Evp)
    b_qkv = jnp.concatenate([bq_p, bk_p, bv_p], axis=1)   # (1, 2*Eqp + Evp)
    e_total = w_qkv.shape[1]

    # Batch blocking: amortize the ~0.35us/step grid overhead while keeping >= 2 even
    # grid steps so both v7x TensorCores get work.
    if batch_block is None:
        batch_block = 1 if N <= 2 else min(8, max(1, N // 2))
    B = batch_block
    n_pad = _round_up(N, B)
    if n_pad != N:
        x = jnp.concatenate([x, jnp.zeros((n_pad - N, L, D), dtype)], axis=0)

    grid = (n_pad // B,)
    kernel = functools.partial(_attn_kernel, e_qk_pad=e_qk_pad, e_v_pad=e_v_pad)

    out = pl.pallas_call(
        kernel,
        out_shape=jax.ShapeDtypeStruct((n_pad, L, e_v_pad), dtype),
        grid_spec=pltpu.PrefetchScalarGridSpec(
            num_scalar_prefetch=0,
            grid=grid,
            in_specs=[
                pl.BlockSpec((B, L, D), lambda n: (n, 0, 0)),       # x tile
                pl.BlockSpec((D, e_total), lambda n: (0, 0)),       # fused Wqkv (resident)
                pl.BlockSpec((1, e_total), lambda n: (0, 0)),       # fused bias (resident)
            ],
            out_specs=pl.BlockSpec((B, L, e_v_pad), lambda n: (n, 0, 0)),
        ),
        compiler_params=pltpu.CompilerParams(
            dimension_semantics=("parallel",),
            vmem_limit_bytes=32 * 1024 * 1024,
        ),
    )(x, w_qkv, b_qkv)

    # Strip batch padding and lane padding (padded output columns are exactly zero).
    return out[:N, :, :E_v]


def _reference(x, wq, bq, wk, bk, wv, bv):
    q = jnp.einsum("nld,ed->nle", x, wq) + bq
    k = jnp.einsum("nld,ed->nle", x, wk) + bk
    v = jnp.einsum("nld,ed->nle", x, wv) + bv
    scale = 1.0 / math.sqrt(q.shape[-1])
    s = jnp.einsum("nqe,nke->nqk", q, k) * scale
    p = jax.nn.softmax(s, axis=-1)
    return jnp.einsum("nqk,nke->nqe", p, v)


if __name__ == "__main__":
    # Module hyper-params (kernel_size=1, linear=False defaults)
    in_dim, key_dim, out_dim, num_heads = 8, 8, 8, 2
    N, L = 2, 16
    E_qk = key_dim * num_heads   # conv_Q / conv_K out channels
    E_v = out_dim * num_heads    # conv_V out channels

    key = jax.random.PRNGKey(0)
    kx, kwq, kbq, kwk, kbk, kwv, kbv = jax.random.split(key, 7)

    x = jax.random.normal(kx, (N, L, in_dim), dtype=jnp.float32)

    # Deterministic synthetic parameters (PyTorch conv weight (E, D, 1) squeezed to (E, D))
    wscale = 1.0 / math.sqrt(in_dim)
    wq = jax.random.uniform(kwq, (E_qk, in_dim), jnp.float32, -wscale, wscale)
    bq = jax.random.uniform(kbq, (1, E_qk), jnp.float32, -wscale, wscale)
    wk = jax.random.uniform(kwk, (E_qk, in_dim), jnp.float32, -wscale, wscale)
    bk = jax.random.uniform(kbk, (1, E_qk), jnp.float32, -wscale, wscale)
    wv = jax.random.uniform(kwv, (E_v, in_dim), jnp.float32, -wscale, wscale)
    bv = jax.random.uniform(kbv, (1, E_v), jnp.float32, -wscale, wscale)

    out = self_attention_layer(x, wq, bq, wk, bk, wv, bv)
    out = jax.block_until_ready(out)

    ref = _reference(x, wq, bq, wk, bk, wv, bv)
    assert out.shape == (N, L, E_v)
    # Tolerance relaxed slightly because the softmax denominator uses the EUP approx reciprocal.
    assert jnp.allclose(out, ref, atol=1e-2, rtol=1e-2), "mismatch vs JAX reference"

    print("KERNEL_OK")
</pallas_src>

<mosaic_0001>
module attributes {stable_mosaic.version = 11 : i64} {
  func.func @_attn_kernel(%arg0: i32, %arg1: memref<1x16x8xf32, #tpu.memory_space<vmem>>, %arg2: memref<8x384xf32, #tpu.memory_space<vmem>>, %arg3: memref<1x384xf32, #tpu.memory_space<vmem>>, %arg4: memref<1x16x128xf32, #tpu.memory_space<vmem>>) attributes {dimension_semantics = [#tpu.dimension_semantics<parallel>], iteration_bounds = array<i64: 2>, scalar_prefetch = 0 : i64, scratch_operands = 0 : i64, tpu.core_type = #tpu.core_type<tc>, window_params = [{transform_indices = @transform_0, window_bounds = array<i64: 1, 16, 8>}, {pipeline_mode = #tpu.pipeline_mode<synchronous>, transform_indices = @transform_1, window_bounds = array<i64: 8, 384>}, {pipeline_mode = #tpu.pipeline_mode<synchronous>, transform_indices = @transform_2, window_bounds = array<i64: 1, 384>}, {transform_indices = @transform_3, window_bounds = array<i64: 1, 16, 128>}]} {
    %c0 = arith.constant 0 : index
    %c0_0 = arith.constant 0 : index
    %c0_1 = arith.constant 0 : index
    %0 = vector.load %arg1[%c0, %c0_0, %c0_1] : memref<1x16x8xf32, #tpu.memory_space<vmem>>, vector<1x16x8xf32>
    %1 = vector.shape_cast %0 : vector<1x16x8xf32> to vector<16x8xf32>
    %c0_2 = arith.constant 0 : index
    %c0_3 = arith.constant 0 : index
    %2 = vector.load %arg2[%c0_2, %c0_3] : memref<8x384xf32, #tpu.memory_space<vmem>>, vector<8x384xf32>
    %cst = arith.constant dense<0.000000e+00> : vector<16x384xf32>
    %3 = tpu.matmul %1, %2, %cst {dimension_numbers = #tpu.dot_dimension_numbers<[1], [0], [0], [1], [0, 0, 1, 1], [], []>} : vector<16x8xf32>, vector<8x384xf32>, vector<16x384xf32> -> vector<16x384xf32>
    %c0_4 = arith.constant 0 : index
    %c0_5 = arith.constant 0 : index
    %4 = vector.load %arg3[%c0_4, %c0_5] : memref<1x384xf32, #tpu.memory_space<vmem>>, vector<1x384xf32>
    %5 = vector.broadcast %4 : vector<1x384xf32> to vector<16x384xf32>
    %6 = arith.addf %3, %5 : vector<16x384xf32>
    %7 = vector.extract_strided_slice %6 {offsets = [0, 0], sizes = [16, 128], strides = [1, 1]} : vector<16x384xf32> to vector<16x128xf32>
    %8 = vector.shape_cast %7 : vector<16x128xf32> to vector<1x16x128xf32>
    %9 = vector.extract_strided_slice %6 {offsets = [0, 128], sizes = [16, 128], strides = [1, 1]} : vector<16x384xf32> to vector<16x128xf32>
    %10 = vector.shape_cast %9 : vector<16x128xf32> to vector<1x16x128xf32>
    %11 = vector.extract_strided_slice %6 {offsets = [0, 256], sizes = [16, 128], strides = [1, 1]} : vector<16x384xf32> to vector<16x128xf32>
    %12 = vector.shape_cast %11 : vector<16x128xf32> to vector<1x16x128xf32>
    %cst_6 = arith.constant dense<0.000000e+00> : vector<1x16x16xf32>
    %13 = tpu.matmul %8, %10, %cst_6 {dimension_numbers = #tpu.dot_dimension_numbers<[2], [2], [1], [1], [0, 0, 0, 1, 1, 1], [0], [0]>} : vector<1x16x128xf32>, vector<1x16x128xf32>, vector<1x16x16xf32> -> vector<1x16x16xf32>
    %cst_7 = arith.constant dense<0xFF800000> : vector<1x16xf32>
    %14 = vector.multi_reduction <maximumf>, %13, %cst_7 [2] : vector<1x16x16xf32> to vector<1x16xf32>
    %15 = vector.shape_cast %14 : vector<1x16xf32> to vector<1x16x1xf32>
    %16 = vector.broadcast %15 : vector<1x16x1xf32> to vector<1x16x16xf32>
    %17 = arith.subf %13, %16 : vector<1x16x16xf32>
    %18 = math.exp %17 : vector<1x16x16xf32>
    %cst_8 = arith.constant dense<0.000000e+00> : vector<1x16xf32>
    %19 = vector.multi_reduction <add>, %18, %cst_8 [2] : vector<1x16x16xf32> to vector<1x16xf32>
    %20 = vector.shape_cast %19 : vector<1x16xf32> to vector<1x16x1xf32>
    %21 = tpu.reciprocal %20 {approx = true} : vector<1x16x1xf32> -> vector<1x16x1xf32>
    %22 = vector.broadcast %21 : vector<1x16x1xf32> to vector<1x16x16xf32>
    %23 = arith.mulf %18, %22 : vector<1x16x16xf32>
    %cst_9 = arith.constant dense<0.000000e+00> : vector<1x16x128xf32>
    %24 = tpu.matmul %23, %12, %cst_9 {dimension_numbers = #tpu.dot_dimension_numbers<[2], [1], [1], [2], [0, 0, 0, 1, 1, 2], [0], [0]>} : vector<1x16x16xf32>, vector<1x16x128xf32>, vector<1x16x128xf32> -> vector<1x16x128xf32>
    %c0_10 = arith.constant 0 : index
    %c0_11 = arith.constant 0 : index
    %c0_12 = arith.constant 0 : index
    %25 = vector.load %arg4[%c0_10, %c0_11, %c0_12] : memref<1x16x128xf32, #tpu.memory_space<vmem>>, vector<1x16x128xf32>
    tpu.vector_store %arg4[%c0_10, %c0_11, %c0_12], %24 {strides = array<i32>} : memref<1x16x128xf32, #tpu.memory_space<vmem>>, vector<1x16x128xf32>,
    return
  }
  func.func @transform_0(%arg0: i32) -> (i32, i32, i32) {
    %c0_i32 = arith.constant 0 : i32
    %c0_i32_0 = arith.constant 0 : i32
    %c0_i32_1 = arith.constant 0 : i32
    return %arg0, %c0_i32, %c0_i32_0 : i32, i32, i32
  }
  func.func @transform_1(%arg0: i32) -> (i32, i32) {
    %c0_i32 = arith.constant 0 : i32
    %c0_i32_0 = arith.constant 0 : i32
    %c0_i32_1 = arith.constant 0 : i32
    return %c0_i32, %c0_i32_0 : i32, i32
  }
  func.func @transform_2(%arg0: i32) -> (i32, i32) {
    %c0_i32 = arith.constant 0 : i32
    %c0_i32_0 = arith.constant 0 : i32
    %c0_i32_1 = arith.constant 0 : i32
    return %c0_i32, %c0_i32_0 : i32, i32
  }
  func.func @transform_3(%arg0: i32) -> (i32, i32, i32) {
    %c0_i32 = arith.constant 0 : i32
    %c0_i32_0 = arith.constant 0 : i32
    %c0_i32_1 = arith.constant 0 : i32
    return %arg0, %c0_i32, %c0_i32_0 : i32, i32, i32
  }
}

</mosaic_0001>

<bundles_post_ra>
// kernel: tpu_custom_call.1
= control target key start
LH: loop header
LB: loop body
LE: loop exit
PB: predicated region body
PF: predicated region fallthrough
CT: control target
= control target key end

     0   :  { %8 = vsyncpa [#allocation3], 0  ;;  %s680_s0 = inlined_call_operand.vmem [shape: f32[2,16,8], index: 0, kind: input, shape index: {}]   ;;  %s681_s1 = inlined_call_operand.vmem [shape: f32[8,384], index: 1, kind: input, shape index: {}]   ;;  %s682_s2 = inlined_call_operand.vmem [shape: f32[1,384], index: 2, kind: input, shape index: {}]   ;;  %s683_s3 = inlined_call_operand.hbm [shape: f32[2,16,128], index: 3, kind: output, shape index: {}]  }
   0x1   :  { %10 = vsyncpa [#allocation3 + $0x1], 0  ;;  %s571_s12 = smov 0   ;;  %s573_s13 = smov 0  }
   0x2   :  { %s575_s14 = smov 0   ;;  %s577_s15 = smov 0  }
   0x3 LB: > { %s592_s16 = sadd.s32 4294967295, %s547_s15   ;;  %s413_s17 = sadd.s32 4294967294, %s547_s15   ;;  %s547_s15 = sphi %s577_s15, %s689_s15   ;;  %s543_s14 = sphi %s575_s14, %s688_s14   ;;  %s539_s13 = sphi %s573_s13, %s687_s13   ;;  %s535_s12 = sphi %s571_s12, %s686_s12  }
   0x4   : > { %s596_s18 = sadd.s32 1, %s547_s15   ;;  %s91_s19 = sadd.s32 1, %s543_s14 }
   0x5   : > { %s88_s20 = ssub.s32 %s547_s15, %s596_s18  ;;  %p101_p0 = scmp.ne.s32.totalorder %s543_s14, %s539_s13 }
   0x6   : > { %p89_p1 = scmp.eq.s32.totalorder %s88_s20, 0  ;;  %p102_p2 = scmp.eq.s32.totalorder %s592_s16, 1 }
   0x7   : > { %p107_p3 = scmp.ne.s32.totalorder %s539_s13, %s535_s12  ;;  %p108_p4 = scmp.eq.s32.totalorder %s413_s17, 1 }
   0x8   : > { %s607_s21 = scalar_select %p89_p1, %s543_s14, %s91_s19  }
   0x9   : > { %p609_p5 = por %p102_p2, %p101_p0  ;;  %p613_p6 = por %p108_p4, %p107_p3 }
   0xa   : > { %p416_p7 = scmp.ge.s32.totalorder %s547_s15, 1  ;;  %p140_p8 = scmp.lt.s32.totalorder %s547_s15, 3 }
   0xc   : > { %p141_p9 = pnand %p416_p7, %p140_p8 }
   0xd   : > { %p164_p10 = scmp.lt.s32.totalorder (!%p141_p9), %s592_s16, 1  ;;  %s161_s10 = sand.u32 (!%p141_p9), 1, %s539_s13  }
   0xe   : > { %144 = sbr.rel (%p141_p9) target bundleno = 699 (0x2bb), region = 32  ;;  %s417_s11 = sshll.u32 (!%p141_p9), %s161_s10, 4 }
   0xf   : > { %s434_s17 = sshll.u32 (!%p141_p9), %s592_s16, 4  ;;  %s163_s25 = scalar_lea.vmem (!%p141_p9), [#allocation2], %s417_s11 }
  0x10   : > { %s347_s24 = scalar_lea.hbm (!%p141_p9), %s683_s3, %s434_s17  ;;  %s348_s26 = sshll.u32 (!%p141_p9), %s163_s25, 4  ;;  %s349_s26 = int_to_ptr.vmem [resolvable:$true] %s348_s26 }
  0x11   : > { %s350_s27 = sshll.u32 (!%p141_p9), %s347_s24, 4  ;;  %s351_s27 = int_to_ptr.hbm [resolvable:$true] %s350_s27 }
  0x13   : > { %v171_v0 = vld [vmem:[%s681_s1] sm:$0xff]  ;;  %v172_v1 = vld [vmem:[%s681_s1 + $0x8] sm:$0xff]  ;;  %s165_s28 = scalar_select %p164_p10, %s592_s16, 1  ;;  %vm182_vm0 = vcmask 64512   ;;  %v173_v15 = vld [vmem:[%s681_s1 + $0x10] sm:$0xff]  ;;  %vm281_vm1 = vcmask 130048  }
  0x14   : > { %435 = vmatpush.msra.mxu1 %v171_v0  ;;  %204 = vmatpush.msra.mxu0 %v171_v0  ;;  %v174_v6 = vld [vmem:[%s682_s2] sm:$0x7] }
  0x15   : > { %s433_s29 = sshll.u32 %s165_s28, 4  ;;  %v177_v7 = vperm.slane %v174_v6, 1  ;;  %v176_v11 = vperm.slane %v174_v6, 0  ;;  %250 = vmatpush.msra.mxu2 %v173_v15  ;;  %v178_v21 = vperm.slane %v174_v6, 2  ;;  %s336_s28 = scalar_lea.sflag [#allocation3], %s161_s10 }
  0x16   : > { %227 = vmatpush.msrb.mxu1 %v172_v1  ;;  %s168_s5 = scalar_lea.vmem %s680_s0, %s433_s29  ;;  %s499_s29 = sshra.s32 %s351_s27, 4  ;;  %s500_s29 = int_to_ptr.hbm [resolvable:$true] %s499_s29 }
  0x17   : > { %v170_v2 = vld [vmem:[%s168_s5 + $0x8] sm:$0xff]  ;;  %v169_v3 = vld [vmem:[%s168_s5] sm:$0xff]  ;;  %s501_s30 = scalar_lea.hbm %s500_s29, 16  ;;  %s505_s5 = scalar_lea.hbm %s683_s3, 32 }
  0x18   : > { %421 = vmatmul.msk.f32.vlgmr.msra.gmra.mxu1 %vm182_vm0, %v170_v2  ;;  %420 = vmatmul.msk.f32.vlgmr.msra.gmra.mxu0 %vm182_vm0, %v169_v3  ;;  %p502_p11 = scmp.ne.s32.totalorder %s500_s29, %s501_s30  ;;  %p506_p0 = scmp.lt.s32.totalorder %s500_s29, %s683_s3 }
  0x19   : > { %424 = vmatmul.msk.f32.vlgmr.msra.gmra.mxu2 %vm182_vm0, %v169_v3  ;;  %p507_p1 = scmp.lt.s32.totalorder %s505_s5, %s501_s30 }
  0x1a   : > { %p503_p12 = pnand %p502_p11, %p609_p5 }
  0x1b   : > { %p508_p2 = por %p507_p1, %p506_p0 }
  0x1c   : > { %p504_p13 = pneg %p503_p12 }
  0x1e   : > { %p509_p3 = pnand %p508_p2, %p504_p13 }
  0x20   : > { %422 = vmatmul.msk.f32.vlgmr.msrb.gmra.mxu1 %vm182_vm0, %v169_v3 }
  0x21   : > { %425 = vmatmul.msk.f32.gmra.mxu2 %vm182_vm0, %v170_v2 }
  0x28   : > { %423 = vmatmul.msk.f32.gmra.mxu1 %vm182_vm0, %v170_v2 }
  0x95   : > { %v209_v4 = vpop.f32.mrf.mxu1  ;;  %v206_v10 = vpop.f32.mrf.mxu0 }
  0x96   : > { %v207_v13 = vadd.f32 %v206_v10, %v176_v11  ;;  %v210_v14 = vadd.f32 %v209_v4, %v176_v11 }
  0x9c   : > { %v252_v20 = vpop.f32.mrf.mxu2 }
  0x9d   : > { %v229_v5 = vpop.f32.mrf.mxu1  ;;  %v253_v26 = vadd.f32 %v252_v20, %v178_v21 }
  0x9e   : > { %v230_v12 = vadd.f32 %v229_v5, %v177_v7 }
  0xa4   : > { %v255_v24 = vpop.f32.mrf.mxu2 }
  0xa5   : > { %v232_v8 = vpop.f32.mrf.mxu1  ;;  %v256_v27 = vadd.f32 %v255_v24, %v178_v21 }
  0xa6   : > { %v233_v9 = vadd.f32 %v232_v8, %v177_v7 }
  0xa7   : > { %324 = vmatpush.msrb.mxu0 %v256_v27 }
  0xa8   : > { %272 = vmatpush.xpose.msra.mxu3 %v233_v9 }
  0xa9   : > { %325 = vmatpush.msrb.mxu0 %v253_v26 }
  0xac   : > { %273 = vmatpush.xpose.msra.mxu3 %v230_v12 }
  0xaf   : > { %274 = vmatmul.f32.vlgmr.msra.gmra.mxu3 %v207_v13 }
  0xb7   : > { %277 = vmatmul.f32.gmra.mxu3 %v210_v14 }
 0x132   : > { %v275_v16 = vpop.f32.mrf.mxu3 }
 0x133   : > { %v282_v17 = vsel %vm281_vm1, %v275_v16, -inf }
 0x134   : > { %283 = vmax.xlane.f32.xlu0 %v282_v17 }
 0x13a   : > { %v278_v18 = vpop.f32.mrf.mxu3 }
 0x13b   : > { %v285_v19 = vsel %vm281_vm1, %v278_v18, -inf }
 0x13c   : > { %286 = vmax.xlane.f32.xlu0 %v285_v19 }
 0x1a7   : > { %v284_v22 = vpop.xlane.xlu0 %283 }
 0x1a8   : > { %v288_v23 = vsub.f32 %v275_v16, %v284_v22 }
 0x1aa   : > { %v290_v25 = vmul.f32 1.442695, %v288_v23 }
 0x1ac   : > { %477 = vpow2.f32 %v290_v25 }
 0x1af   : > { %v287_v28 = vpop.xlane.xlu0 %286 }
 0x1b0   : > { %v289_v29 = vsub.f32 %v278_v18, %v287_v28 }
 0x1b2   : > { %v478_v30 = vpop.eup %477  ;;  %v292_v31 = vmul.f32 1.442695, %v289_v29 }
 0x1b3   : > { %v294_v32 = vsel %vm281_vm1, %v478_v30, 0.0 }
 0x1b4   : > { %479 = vpow2.f32 %v292_v31  ;;  %295 = vadd.xlane.f32.xlu1 %v294_v32 }
 0x1ba   : > { %v480_v33 = vpop.eup %479 }
 0x1bb   : > { %v297_v34 = vsel %vm281_vm1, %v480_v33, 0.0 }
 0x1bc   : > { %298 = vadd.xlane.f32.xlu1 %v297_v34 }
 0x227   : > { %v296_v35 = vpop.xlane.xlu1 %295 }
 0x228   : > { %481 = vrcp.f32 %v296_v35 }
 0x22e   : > { %v482_v36 = vpop.eup %481 }
 0x22f   : > { %v299_v37 = vpop.xlane.xlu1 %298  ;;  %v302_v38 = vmul.f32 %v482_v36, %v478_v30 }
 0x230   : > { %483 = vrcp.f32 %v299_v37 }
 0x231   : > { %426 = vmatmul.msk.f32.vlgmr.msrb.gmra.mxu0 %vm281_vm1, %v302_v38 }
 0x236   : > { %v484_v39 = vpop.eup %483 }
 0x237   : > { %v303_v40 = vmul.f32 %v484_v39, %v480_v33 }
 0x239   : > { %427 = vmatmul.msk.f32.gmra.mxu0 %vm281_vm1, %v303_v40 }
 0x2ae   : > { %v327_v41 = vpop.f32.mrf.mxu0 }
 0x2af   : > { %333 = vst [vmem:[%s163_s25] sm:$0xff] %v327_v41 }
 0x2b6   : > { %v330_v42 = vpop.f32.mrf.mxu0 }
 0x2b7   : > { %334 = vst [vmem:[%s163_s25 + $0x8] sm:$0xff] %v330_v42 }
 0x2b8   : > { %512 = shalt.err (!%p509_p3)
}
 0x2b9   : > { %s549_s8 = smov 128   ;;  %s550_s9 = smov 8  }
 0x2ba   : > { %436 = dma.vmem_to_hbm [thread:$0]  (%p609_p5), %s349_s26, 256, %s351_s27, %s336_s28, %s549_s8, %s549_s8, %s550_s9  }
 0x2bb PF: > { %p442_p4 = scmp.ge.s32.totalorder %s547_s15, 2  ;;  %s365_s10 = sand.u32 1, %s535_s12  }
 0x2bc   : > { %s366_s11 = scalar_lea.sflag [#allocation3], %s365_s10 }
 0x2bd   : > { %p439_p7 = pnand %p442_p4, %p613_p6 }
 0x2bf   : > { %p440_p8 = pneg %p439_p7 }
 0x2c1   : > { %530 = dma.done.wait (%p440_p8), %s366_s11, 256  }
 0x2c2   : > { %532 = vsyncadd (%p440_p8), %s366_s11, 4294967040  ;;  %p13_p9 = scmp.ge.s32.totalorder %s596_s18, 4   ;;  %s686_s12 = smov %s539_s13 }
 0x2c3   : > { %s687_s13 = smov %s543_s14  ;;  %s688_s14 = smov %s607_s21 }
 0x2c4   : > { %s689_s15 = smov %s596_s18  ;;  %15 = sbr.rel (!%p13_p9) target bundleno = 3 (0x3), region = 67 }
 0x2c9   :  { %372 = vsyncpa [#allocation3], 1 }
 0x2ca   :  { %374 = vsyncpa [#allocation3 + $0x1], 1 }

</bundles_post_ra>
